<compile_context>
chip_gen: v5e
topology: v5e:2x2
jax: 0.10.0
libtpu: 0.0.40
codegen_flags: <defaults>
</compile_context>

<pallas_src>
import functools

import jax
import jax.numpy as jnp
from jax.experimental import pallas as pl
from jax.experimental.pallas import tpu as pltpu


# --------------------------------------------------------------------------
# kernels
# --------------------------------------------------------------------------
def _msg_kernel_eh(e_ref, h_ref, we_ref, wh_ref, b_ref, o_ref, *, relu, tb):
    """One (batch-pack, N-tile) block.

    e_ref : (TB, Fe, TN)   edge features (node index on lanes)
    h_ref : (TB, Fn, TN)   node features
    we_ref: (Mout, Fe)     edge weight (rows placed / zero-padded for concat)
    wh_ref: (Mout, Fn)     node weight (rows placed / zero-padded for concat)
    b_ref : (Mout, 1)      fused bias (f32)
    o_ref : (TB, Mout, TN) output messages (lane-dense in N)
    """
    w_e = we_ref[...]
    w_h = wh_ref[...]
    bias = b_ref[...]
    for i in range(tb):                       # static unroll over packed batches
        e = e_ref[i]
        h = h_ref[i]
        if e.dtype != w_e.dtype:              # in-kernel cast (no wrapper copy)
            e = e.astype(w_e.dtype)
        if h.dtype != w_h.dtype:
            h = h.astype(w_h.dtype)
        acc = jnp.dot(w_e, e, preferred_element_type=jnp.float32)
        acc = acc + jnp.dot(w_h, h, preferred_element_type=jnp.float32)
        acc = acc + bias                      # epilogue stays f32 (v5e friendly)
        if relu:
            acc = jnp.maximum(acc, 0.0)
        o_ref[i] = acc.astype(o_ref.dtype)


def _msg_kernel_e(e_ref, we_ref, b_ref, o_ref, *, tb):
    """'linear_edge' variant: node features are never streamed."""
    w_e = we_ref[...]
    bias = b_ref[...]
    for i in range(tb):
        e = e_ref[i]
        if e.dtype != w_e.dtype:
            e = e.astype(w_e.dtype)
        acc = jnp.dot(w_e, e, preferred_element_type=jnp.float32) + bias
        o_ref[i] = acc.astype(o_ref.dtype)


# --------------------------------------------------------------------------
# tiling
# --------------------------------------------------------------------------
def _choose_tiling(B, N, n_tile_target):
    """Pick (TB, TN): TN lane-dense multiple of 128, TB packs small-N batches.

    Guarantees >= 2 total grid steps whenever the problem allows it (v7x has
    two TensorCores; a single mega-step would leave one idle).
    """
    lane = 128
    n_up = -(-N // lane) * lane                       # N rounded up to 128
    tn = max(lane, min(n_tile_target, n_up))
    tn = (tn // lane) * lane

    tb = 1
    if tn < n_tile_target:                            # small-N: pack batches
        tb = max(1, min(B, n_tile_target // tn, 32))

    def steps(tb_, tn_):
        return (-(-B // tb_)) * (-(-N // tn_))

    if steps(tb, tn) < 2:                             # megacore guard (v7x)
        if B >= 2 and tb > 1:
            tb = (tb + 1) // 2
        elif N > lane and tn > lane:
            half = -(-(-(-N // 2)) // lane) * lane
            tn = max(lane, min(tn, half))
    return tb, tn


# --------------------------------------------------------------------------
# wrapper
# --------------------------------------------------------------------------
def _message_pallas(e_vw, h_w, wk_e, wk_h, bk, *, relu, use_h,
                    out_dtype=jnp.float32, n_tile_target=8192):
    B, Fe, N = e_vw.shape
    Mout = wk_e.shape[0]
    tb, tn = _choose_tiling(B, N, n_tile_target)
    grid = (pl.cdiv(B, tb), pl.cdiv(N, tn))

    # Exact output shape: partial boundary blocks are masked by Pallas, so no
    # wrapper-side pad of the inputs and no trailing slice of the output.
    out_shape = jax.ShapeDtypeStruct((B, Mout, N), out_dtype)

    e_spec = pl.BlockSpec((tb, Fe, tn), lambda b, n: (b, 0, n))
    we_spec = pl.BlockSpec((Mout, Fe), lambda b, n: (0, 0))
    b_spec = pl.BlockSpec((Mout, 1), lambda b, n: (0, 0))
    out_spec = pl.BlockSpec((tb, Mout, tn), lambda b, n: (b, 0, n))
    cparams = pltpu.CompilerParams(
        dimension_semantics=("parallel", "parallel"))

    # Advisory cost estimate (bytes dominate: the kernel is HBM-bound).
    in_isz = jnp.dtype(e_vw.dtype).itemsize
    out_isz = jnp.dtype(out_dtype).itemsize
    bytes_accessed = B * N * (Fe * in_isz + Mout * out_isz)
    flops = 2 * B * N * Mout * Fe
    if use_h:
        Fn = h_w.shape[1]
        bytes_accessed += B * N * Fn * jnp.dtype(h_w.dtype).itemsize
        flops += 2 * B * N * Mout * Fn
    cost = pl.CostEstimate(flops=int(flops), transcendentals=0,
                           bytes_accessed=int(bytes_accessed))

    if use_h:
        Fn = h_w.shape[1]
        h_spec = pl.BlockSpec((tb, Fn, tn), lambda b, n: (b, 0, n))
        wh_spec = pl.BlockSpec((Mout, Fn), lambda b, n: (0, 0))
        out = pl.pallas_call(
            functools.partial(_msg_kernel_eh, relu=relu, tb=tb),
            out_shape=out_shape,
            grid=grid,
            in_specs=[e_spec, h_spec, we_spec, wh_spec, b_spec],
            out_specs=out_spec,
            compiler_params=cparams,
            cost_estimate=cost,
        )(e_vw, h_w, wk_e, wk_h, bk)
    else:
        out = pl.pallas_call(
            functools.partial(_msg_kernel_e, tb=tb),
            out_shape=out_shape,
            grid=grid,
            in_specs=[e_spec, we_spec, b_spec],
            out_specs=out_spec,
            compiler_params=cparams,
            cost_estimate=cost,
        )(e_vw, wk_e, bk)
    return out


# --------------------------------------------------------------------------
# module
# --------------------------------------------------------------------------
class MessageFunction:
    """JAX/Pallas re-implementation of the PyTorch MessageFunction module."""

    def __init__(self, message_def, args, key,
                 compute_dtype=jnp.float32, out_dtype=jnp.float32,
                 n_tile_target=8192):
        self.m_definition = message_def.lower()
        if self.m_definition not in (
                "linear", "linear_edge", "linear_concat", "linear_concat_relu"):
            raise ValueError("Incorrect definition " + message_def)
        self.args = args
        self.out_dtype = out_dtype
        self.n_tile_target = n_tile_target

        Fe = args["edge_feature_size"]
        Fn = args["node_feature_size"]
        M = args["message_size"]
        concat = self.m_definition in ("linear_concat", "linear_concat_relu")
        Me = Mh = (M // 2) if concat else M

        k1, k2, k3, k4 = jax.random.split(key, 4)
        lim_e = 1.0 / (Fe ** 0.5)
        lim_h = 1.0 / (Fn ** 0.5)
        # torch.nn.Linear-style deterministic synthetic init.
        self.w_e = jax.random.uniform(k1, (Fe, Me), jnp.float32, -lim_e, lim_e)
        self.b_e = jax.random.uniform(k2, (Me,), jnp.float32, -lim_e, lim_e)
        if self.m_definition == "linear_edge":
            self.w_h = None
            self.b_h = None
        else:
            self.w_h = jax.random.uniform(k3, (Fn, Mh), jnp.float32, -lim_h, lim_h)
            self.b_h = jax.random.uniform(k4, (Mh,), jnp.float32, -lim_h, lim_h)

        # ---- kernel-layout fused parameters: out = Wk_e@e + Wk_h@h + bk ----
        if self.m_definition == "linear":
            Mout = M
            wk_e = self.w_e.T                                   # (M, Fe)
            wk_h = self.w_h.T                                   # (M, Fn)
            bk = (self.b_e + self.b_h).reshape(Mout, 1)
        elif self.m_definition == "linear_edge":
            Mout = M
            wk_e = self.w_e.T
            wk_h = None
            bk = self.b_e.reshape(Mout, 1)
        else:  # linear_concat / linear_concat_relu: block layout -> no concat
            Mout = Me + Mh
            wk_e = jnp.zeros((Mout, Fe), jnp.float32).at[:Me].set(self.w_e.T)
            wk_h = jnp.zeros((Mout, Fn), jnp.float32).at[Me:].set(self.w_h.T)
            bk = jnp.concatenate([self.b_e, self.b_h]).reshape(Mout, 1)

        self.wk_e = wk_e.astype(compute_dtype)
        self.wk_h = None if wk_h is None else wk_h.astype(compute_dtype)
        self.bk = bk.astype(jnp.float32)     # epilogue stays f32 on all chips
        self.relu = self.m_definition == "linear_concat_relu"
        self.use_h = self.m_definition != "linear_edge"

    def forward(self, h_w, e_vw, args=None):
        del args  # CUDA flag in the torch module; irrelevant here
        # NOTE: no wrapper-side astype — inputs stream in their HBM dtype and
        # any cast to the (possibly bf16) weight dtype happens inside the
        # kernel, avoiding an extra HBM round trip on a bandwidth-bound op.
        return _message_pallas(e_vw, h_w if self.use_h else None,
                               self.wk_e, self.wk_h, self.bk,
                               relu=self.relu, use_h=self.use_h,
                               out_dtype=self.out_dtype,
                               n_tile_target=self.n_tile_target)

    __call__ = forward


# --------------------------------------------------------------------------
# self-test
# --------------------------------------------------------------------------
if __name__ == "__main__":
    B = 2
    N = 8
    args = {"edge_feature_size": 16,
            "node_feature_size": 12,
            "message_size": 32}

    key = jax.random.PRNGKey(0)
    kparam, ke, kh, ke2, kh2 = jax.random.split(key, 5)

    e_vw = jax.random.normal(ke, (B, args["edge_feature_size"], N), jnp.float32)
    h_w = jax.random.normal(kh, (B, args["node_feature_size"], N), jnp.float32)

    # --- 'linear' ----------------------------------------------------------
    mf = MessageFunction("linear", args, kparam)
    msg = jax.block_until_ready(mf(h_w, e_vw))
    ref = (jnp.einsum("bfn,fm->bmn", e_vw, mf.w_e) + mf.b_e[None, :, None]
           + jnp.einsum("bfn,fm->bmn", h_w, mf.w_h) + mf.b_h[None, :, None])
    assert msg.shape == (B, args["message_size"], N)
    assert jnp.allclose(msg, ref, atol=1e-5, rtol=1e-5)

    # --- 'linear_edge' -----------------------------------------------------
    mf_e = MessageFunction("linear_edge", args, kparam)
    msg_e = jax.block_until_ready(mf_e(h_w, e_vw))
    ref_e = jnp.einsum("bfn,fm->bmn", e_vw, mf_e.w_e) + mf_e.b_e[None, :, None]
    assert msg_e.shape == (B, args["message_size"], N)
    assert jnp.allclose(msg_e, ref_e, atol=1e-5, rtol=1e-5)

    # --- 'linear_concat_relu' ----------------------------------------------
    mf2 = MessageFunction("linear_concat_relu", args, kparam)
    msg2 = jax.block_until_ready(mf2(h_w, e_vw))
    pe = jnp.einsum("bfn,fm->bmn", e_vw, mf2.w_e) + mf2.b_e[None, :, None]
    ph = jnp.einsum("bfn,fm->bmn", h_w, mf2.w_h) + mf2.b_h[None, :, None]
    ref2 = jnp.maximum(jnp.concatenate([pe, ph], axis=1), 0.0)
    assert msg2.shape == (B, args["message_size"], N)
    assert jnp.allclose(msg2, ref2, atol=1e-5, rtol=1e-5)

    # --- multi-tile + masked partial last N block (no wrapper pad/slice) ----
    N2 = 200   # not a multiple of 128 -> exercises the masked boundary block
    e2 = jax.random.normal(ke2, (B, args["edge_feature_size"], N2), jnp.float32)
    h2 = jax.random.normal(kh2, (B, args["node_feature_size"], N2), jnp.float32)
    msg3 = jax.block_until_ready(
        _message_pallas(e2, h2, mf.wk_e, mf.wk_h, mf.bk,
                        relu=False, use_h=True, n_tile_target=128))
    ref3 = (jnp.einsum("bfn,fm->bmn", e2, mf.w_e) + mf.b_e[None, :, None]
            + jnp.einsum("bfn,fm->bmn", h2, mf.w_h) + mf.b_h[None, :, None])
    assert msg3.shape == (B, args["message_size"], N2)
    assert jnp.allclose(msg3, ref3, atol=1e-5, rtol=1e-5)

    print("KERNEL_OK")
</pallas_src>

<mosaic_0001>
module attributes {stable_mosaic.version = 11 : i64} {
  func.func @_msg_kernel_eh(%arg0: i32, %arg1: i32, %arg2: memref<1x16x128xf32, #tpu.memory_space<vmem>>, %arg3: memref<1x12x128xf32, #tpu.memory_space<vmem>>, %arg4: memref<32x16xf32, #tpu.memory_space<vmem>>, %arg5: memref<32x12xf32, #tpu.memory_space<vmem>>, %arg6: memref<32x1xf32, #tpu.memory_space<vmem>>, %arg7: memref<1x32x128xf32, #tpu.memory_space<vmem>>) attributes {dimension_semantics = [#tpu.dimension_semantics<parallel>, #tpu.dimension_semantics<parallel>], iteration_bounds = array<i64: 2, 1>, scalar_prefetch = 0 : i64, scratch_operands = 0 : i64, tpu.core_type = #tpu.core_type<tc>, window_params = [{transform_indices = @transform_0, window_bounds = array<i64: 1, 16, 128>}, {transform_indices = @transform_1, window_bounds = array<i64: 1, 12, 128>}, {pipeline_mode = #tpu.pipeline_mode<synchronous>, transform_indices = @transform_2, window_bounds = array<i64: 32, 16>}, {pipeline_mode = #tpu.pipeline_mode<synchronous>, transform_indices = @transform_3, window_bounds = array<i64: 32, 12>}, {pipeline_mode = #tpu.pipeline_mode<synchronous>, transform_indices = @transform_4, window_bounds = array<i64: 32, 1>}, {transform_indices = @transform_5, window_bounds = array<i64: 1, 32, 128>}]} {
    %c0 = arith.constant 0 : index
    %c0_0 = arith.constant 0 : index
    %0 = vector.load %arg4[%c0, %c0_0] : memref<32x16xf32, #tpu.memory_space<vmem>>, vector<32x16xf32>
    %c0_1 = arith.constant 0 : index
    %c0_2 = arith.constant 0 : index
    %1 = vector.load %arg5[%c0_1, %c0_2] : memref<32x12xf32, #tpu.memory_space<vmem>>, vector<32x12xf32>
    %c0_3 = arith.constant 0 : index
    %c0_4 = arith.constant 0 : index
    %2 = vector.load %arg6[%c0_3, %c0_4] : memref<32x1xf32, #tpu.memory_space<vmem>>, vector<32x1xf32>
    %c0_5 = arith.constant 0 : index
    %c0_6 = arith.constant 0 : index
    %c0_7 = arith.constant 0 : index
    %3 = vector.load %arg2[%c0_5, %c0_6, %c0_7] : memref<1x16x128xf32, #tpu.memory_space<vmem>>, vector<1x16x128xf32>
    %4 = vector.shape_cast %3 : vector<1x16x128xf32> to vector<16x128xf32>
    %c0_8 = arith.constant 0 : index
    %c0_9 = arith.constant 0 : index
    %c0_10 = arith.constant 0 : index
    %5 = vector.load %arg3[%c0_8, %c0_9, %c0_10] : memref<1x12x128xf32, #tpu.memory_space<vmem>>, vector<1x12x128xf32>
    %6 = vector.shape_cast %5 : vector<1x12x128xf32> to vector<12x128xf32>
    %cst = arith.constant dense<0.000000e+00> : vector<32x128xf32>
    %7 = tpu.matmul %0, %4, %cst {dimension_numbers = #tpu.dot_dimension_numbers<[1], [0], [0], [1], [0, 0, 1, 1], [], []>} : vector<32x16xf32>, vector<16x128xf32>, vector<32x128xf32> -> vector<32x128xf32>
    %cst_11 = arith.constant dense<0.000000e+00> : vector<32x128xf32>
    %8 = tpu.matmul %1, %6, %cst_11 {dimension_numbers = #tpu.dot_dimension_numbers<[1], [0], [0], [1], [0, 0, 1, 1], [], []>} : vector<32x12xf32>, vector<12x128xf32>, vector<32x128xf32> -> vector<32x128xf32>
    %9 = arith.addf %7, %8 : vector<32x128xf32>
    %10 = vector.broadcast %2 : vector<32x1xf32> to vector<32x128xf32>
    %11 = arith.addf %9, %10 : vector<32x128xf32>
    %c0_12 = arith.constant 0 : index
    %c0_13 = arith.constant 0 : index
    %c0_14 = arith.constant 0 : index
    %12 = vector.load %arg7[%c0_12, %c0_13, %c0_14] : memref<1x32x128xf32, #tpu.memory_space<vmem>>, vector<1x32x128xf32>
    %13 = vector.shape_cast %12 : vector<1x32x128xf32> to vector<32x128xf32>
    %14 = vector.shape_cast %11 : vector<32x128xf32> to vector<1x32x128xf32>
    tpu.vector_store %arg7[%c0_12, %c0_13, %c0_14], %14 {strides = array<i32>} : memref<1x32x128xf32, #tpu.memory_space<vmem>>, vector<1x32x128xf32>,
    return
  }
  func.func @transform_0(%arg0: i32, %arg1: i32) -> (i32, i32, i32) {
    %c0_i32 = arith.constant 0 : i32
    %c0_i32_0 = arith.constant 0 : i32
    return %arg0, %c0_i32, %arg1 : i32, i32, i32
  }
  func.func @transform_1(%arg0: i32, %arg1: i32) -> (i32, i32, i32) {
    %c0_i32 = arith.constant 0 : i32
    %c0_i32_0 = arith.constant 0 : i32
    return %arg0, %c0_i32, %arg1 : i32, i32, i32
  }
  func.func @transform_2(%arg0: i32, %arg1: i32) -> (i32, i32) {
    %c0_i32 = arith.constant 0 : i32
    %c0_i32_0 = arith.constant 0 : i32
    %c0_i32_1 = arith.constant 0 : i32
    return %c0_i32, %c0_i32_0 : i32, i32
  }
  func.func @transform_3(%arg0: i32, %arg1: i32) -> (i32, i32) {
    %c0_i32 = arith.constant 0 : i32
    %c0_i32_0 = arith.constant 0 : i32
    %c0_i32_1 = arith.constant 0 : i32
    return %c0_i32, %c0_i32_0 : i32, i32
  }
  func.func @transform_4(%arg0: i32, %arg1: i32) -> (i32, i32) {
    %c0_i32 = arith.constant 0 : i32
    %c0_i32_0 = arith.constant 0 : i32
    %c0_i32_1 = arith.constant 0 : i32
    return %c0_i32, %c0_i32_0 : i32, i32
  }
  func.func @transform_5(%arg0: i32, %arg1: i32) -> (i32, i32, i32) {
    %c0_i32 = arith.constant 0 : i32
    %c0_i32_0 = arith.constant 0 : i32
    return %arg0, %c0_i32, %arg1 : i32, i32, i32
  }
}

</mosaic_0001>

<bundles_post_ra>
// kernel: tpu_custom_call.1
= control target key start
LH: loop header
LB: loop body
LE: loop exit
PB: predicated region body
PF: predicated region fallthrough
CT: control target
= control target key end

     0   :  { %s631_s18 = smov 0   ;;  %s633_s19 = smov 0   ;;  %s715_s0 = inlined_call_operand.vmem [shape: f32[2,16,8], index: 0, kind: input, shape index: {}]   ;;  %s716_s1 = inlined_call_operand.vmem [shape: f32[2,12,8], index: 1, kind: input, shape index: {}]   ;;  %s717_s2 = inlined_call_operand.vmem [shape: f32[32,16], index: 2, kind: input, shape index: {}]   ;;  %s718_s3 = inlined_call_operand.vmem [shape: f32[32,12], index: 3, kind: input, shape index: {}]   ;;  %s719_s4 = inlined_call_operand.vmem [shape: f32[32,1], index: 4, kind: input, shape index: {}]   ;;  %s720_s5 = inlined_call_operand.vmem [shape: f32[2,32,8], index: 5, kind: output, shape index: {}]  }
   0x1   :  { %s635_s20 = smov 0  }
   0x2 LB: > { %s27_s21 = sadd.s32 1, %s594_s19  ;;  %p524_p0 = scmp.ge.s32.totalorder %s598_s20, 1  ;;  %s598_s20 = sphi %s635_s20, %s15_s20   ;;  %s594_s19 = sphi %s633_s19, %s722_s19   ;;  %s590_s18 = sphi %s631_s18, %s721_s18  }
   0x3   : > { %p29_p1 = scmp.ge.s32.totalorder %s27_s21, 2  ;;  %p221_p2 = scmp.lt.s32.totalorder %s598_s20, 3 }
   0x5   : > { %s724_s21 = smov (%p29_p1, %s27_s21), 0  ;;  %p222_p3 = pnand %p524_p0, %p221_p2 }
   0x6   : > { %p263_p4 = scmp.lt.s32.totalorder (!%p222_p3), %s590_s18, 1 }
   0x7   : > { %225 = sbr.rel (%p222_p3) target bundleno = 166 (0xa6), region = 40 }
   0xc   : > { %s726_s18 = smov (!%p263_p4, %s590_s18), 1  ;;  %v600_v0 = vmov 0   ;;  %v297_v1 = vld [vmem:[%s719_s4 + $0x10] sm:$0xff]  ;;  %v295_v2 = vld [vmem:[%s719_s4] sm:$0xff]  ;;  %vm316_vm0 = vcmask 1043456   ;;  %vm303_vm1 = vcmask 97280  }
   0xd   : > { %575 = vset.pattern.permute.xlu1 %v600_v0  ;;  %574 = vset.pattern.permute.xlu0 %v600_v0  ;;  %s542_s26 = sshll.u32 %s726_s18, 4  ;;  %v291_v7 = vld [vmem:[%s718_s3] sm:$0xff]  ;;  %v293_v8 = vld [vmem:[%s718_s3 + $0x10] sm:$0xff]  ;;  %vm349_vm2 = vcmask 130048   ;;  %v298_v11 = vld [vmem:[%s719_s4 + $0x18] sm:$0xff] }
   0xe   : > { %403 = vperm.xlu1 %575, %v297_v1   ;;  %393 = vperm.xlu0 %574, %v295_v2   ;;  %s278_s29 = scalar_lea.vmem %s716_s1, %s542_s26  ;;  %s270_s7 = scalar_lea.vmem %s715_s0, %s542_s26  ;;  %v287_v9 = vld [vmem:[%s717_s2] sm:$0xff]  ;;  %v289_v10 = vld [vmem:[%s717_s2 + $0x10] sm:$0xff]  ;;  %v296_v12 = vld [vmem:[%s719_s4 + $0x8] sm:$0xff] }
   0xf   : > { %v302_v3 = vld [vmem:[%s278_s29 + $0x8] sm:$0xf]  ;;  %v301_v4 = vld [vmem:[%s278_s29] sm:$0xff]  ;;  %v294_v14 = vld [vmem:[%s718_s3 + $0x18] sm:$0xff] }
  0x10   : > { %531 = vmatpush.msk.msra.mxu0 %vm316_vm0, %v302_v3  ;;  %545 = vmatpush.msk.msra.mxu2 %vm316_vm0, %v302_v3  ;;  %v300_v5 = vld [vmem:[%s270_s7 + $0x8] sm:$0xff]  ;;  %v299_v6 = vld [vmem:[%s270_s7] sm:$0xff]  ;;  %v290_v16 = vld [vmem:[%s717_s2 + $0x18] sm:$0xff]  ;;  %s544_s7 = sshll.u32 %s726_s18, 5 }
  0x11   : > { %376 = vmatpush.msra.mxu1 %v300_v5  ;;  %547 = vmatpush.msra.mxu3 %v300_v5  ;;  %v292_v13 = vld [vmem:[%s718_s3 + $0x8] sm:$0xff]  ;;  %s286_s10 = scalar_lea.vmem %s720_s5, %s544_s7 }
  0x12   : > { %335 = vmatpush.msra.mxu0 %v301_v4  ;;  %546 = vmatpush.msra.mxu2 %v301_v4  ;;  %v288_v15 = vld [vmem:[%s717_s2 + $0x8] sm:$0xff] }
  0x13   : > { %377 = vmatpush.msra.mxu1 %v299_v6  ;;  %548 = vmatpush.msra.mxu3 %v299_v6 }
  0x14   : > { %532 = vmatmul.msk.f32.vlgmr.msra.gmra.mxu0 %vm303_vm1, %v291_v7  ;;  %534 = vmatmul.msk.f32.vlgmr.msra.gmra.mxu2 %vm303_vm1, %v293_v8 }
  0x15   : > { %536 = vmatmul.msk.f32.vlgmr.msra.gmra.mxu1 %vm349_vm2, %v287_v9  ;;  %538 = vmatmul.msk.f32.vlgmr.msra.gmra.mxu3 %vm349_vm2, %v289_v10 }
  0x16   : > { %408 = vperm.xlu1 %575, %v298_v11   ;;  %398 = vperm.xlu0 %574, %v296_v12  }
  0x1c   : > { %533 = vmatmul.msk.f32.gmra.mxu0 %vm303_vm1, %v292_v13  ;;  %535 = vmatmul.msk.f32.gmra.mxu2 %vm303_vm1, %v294_v14 }
  0x1d   : > { %537 = vmatmul.msk.f32.gmra.mxu1 %vm349_vm2, %v288_v15  ;;  %539 = vmatmul.msk.f32.gmra.mxu3 %vm349_vm2, %v290_v16 }
  0x80   : > { %v394_v18 = vpop.permute.xlu0 %393  ;;  %v404_v23 = vpop.permute.xlu1 %403 }
  0x88   : > { %v399_v30 = vpop.permute.xlu0 %398  ;;  %v409_v35 = vpop.permute.xlu1 %408 }
  0x91   : > { %v337_v17 = vpop.f32.mrf.mxu0 }
  0x92   : > { %v379_v19 = vpop.f32.mrf.mxu1 }
  0x93   : > { %v380_v20 = vadd.f32 %v379_v19, %v337_v17 }
  0x95   : > { %v411_v21 = vadd.f32 %v394_v18, %v380_v20 }
  0x97   : > { %415 = vst [vmem:[%s286_s10] sm:$0xff] %v411_v21  ;;  %v343_v22 = vpop.f32.mrf.mxu2 }
  0x98   : > { %v385_v24 = vpop.f32.mrf.mxu3 }
  0x99   : > { %v386_v25 = vadd.f32 %v385_v24, %v343_v22  ;;  %v340_v26 = vpop.f32.mrf.mxu0 }
  0x9a   : > { %v382_v27 = vpop.f32.mrf.mxu1 }
  0x9b   : > { %v413_v28 = vadd.f32 %v404_v23, %v386_v25  ;;  %v383_v29 = vadd.f32 %v382_v27, %v340_v26 }
  0x9d   : > { %417 = vst [vmem:[%s286_s10 + $0x10] sm:$0xff] %v413_v28  ;;  %v412_v31 = vadd.f32 %v399_v30, %v383_v29 }
  0x9f   : > { %416 = vst [vmem:[%s286_s10 + $0x8] sm:$0xff] %v412_v31  ;;  %v346_v32 = vpop.f32.mrf.mxu2 }
  0xa0   : > { %v388_v33 = vpop.f32.mrf.mxu3 }
  0xa1   : > { %v389_v34 = vadd.f32 %v388_v33, %v346_v32 }
  0xa3   : > { %v414_v36 = vadd.f32 %v409_v35, %v389_v34 }
  0xa5   : > { %418 = vst [vmem:[%s286_s10 + $0x18] sm:$0xff] %v414_v36 }
  0xa6 PF: > { %s15_s20 = sadd.s32 1, %s598_s20   ;;  %s721_s18 = smov %s594_s19 }
  0xa7   : > { %p12_p5 = scmp.ge.s32.totalorder %s15_s20, 4   ;;  %s722_s19 = smov %s724_s21 }
  0xa9   :  { %14 = sbr.rel (!%p12_p5) target bundleno = 2 (0x2), region = 73 }

</bundles_post_ra>
